<compile_context>
chip_gen: v6e
topology: v6e:2x2x1
jax: 0.10.0
libtpu: 0.0.40
codegen_flags: <defaults>
</compile_context>

<pallas_src>
import functools

import jax
import jax.numpy as jnp
from jax.experimental import pallas as pl
from jax.experimental.pallas import tpu as pltpu


# ----------------------------------------------------------------------------
# small helpers
# ----------------------------------------------------------------------------
def _layernorm(x, w, b, eps):
    mean = jnp.mean(x, axis=-1, keepdims=True)
    var = jnp.mean((x - mean) ** 2, axis=-1, keepdims=True)
    return (x - mean) * jax.lax.rsqrt(var + eps) * w + b


def _gelu_tanh(x):
    # gelu_pytorch_tanh
    return 0.5 * x * (1.0 + jnp.tanh(0.7978845608028654 * (x + 0.044715 * x * x * x)))


def _round_up(x, m):
    return ((x + m - 1) // m) * m


def _plan(cfg):
    """Static padding / tiling plan, generation-aware via VMEM capacity."""
    n_real = (cfg["image_size"] // cfg["patch_size"]) ** 2
    i_size = cfg["intermediate_size"]
    try:
        vmem_cap = int(pltpu.get_tpu_info().vmem_capacity_bytes)
    except Exception:
        vmem_cap = 128 * 1024 * 1024
    # v5e/v6e: 128 MiB VMEM, 1 TensorCore  -> large resident token tiles so the
    #   big MLP/QKV weights are fetched once per layer.
    # v7x:     64 MiB VMEM, 2 TensorCores  -> smaller token tiles (weight
    #   re-fetch is cheap at 3.2 TB/s) and a >=2 "parallel" token axis.
    big_vmem = vmem_cap >= 96 * 1024 * 1024
    vmem_limit = min(vmem_cap * 3 // 4, 100 * 1024 * 1024)

    if n_real <= 256 or (big_vmem and n_real <= 1024):
        tq = _round_up(n_real, 8)          # one token tile (e.g. 729 -> 736)
    else:
        tq = 256                           # v7x: 128-256 token tiles
    n_pad = _round_up(n_real, tq)

    ti = i_size if i_size <= 512 else 512  # MLP intermediate tile (lane mult of 128)
    i_pad = _round_up(i_size, ti)          # e.g. 4304 -> 4608

    tn_mlp = n_pad if (big_vmem and n_pad <= 1024) else tq
    return dict(n_real=n_real, n_pad=n_pad, tq=tq, tn_mlp=tn_mlp, ti=ti,
                i_pad=i_pad, vmem_limit=int(vmem_limit), big_vmem=big_vmem)


def _cparams(sem, plan):
    return pltpu.CompilerParams(
        dimension_semantics=sem, vmem_limit_bytes=plan["vmem_limit"])


# ----------------------------------------------------------------------------
# Pallas kernels
# ----------------------------------------------------------------------------
def patch_embed_kernel(p_ref, w_ref, b_ref, pos_ref, out_ref):
    """(tq, K) bf16 @ (K, D) bf16 -> f32, + bias + positional embedding."""
    out_ref[...] = (
        jnp.dot(p_ref[...], w_ref[...], preferred_element_type=jnp.float32)
        + b_ref[...] + pos_ref[...])


def ln_qkv_kernel(x_ref, gw_ref, gb_ref, w_ref, b_ref,
                  q_ref, k_ref, v_ref, ln_ref, *, eps):
    """LN1 (computed once per token tile, reused across heads) + per-head fused
    (tq, D) @ (D, 3*hd) projection; writes whole-head q/k/v bf16 blocks."""
    h = pl.program_id(2)

    @pl.when(h == 0)
    def _():
        ln_ref[...] = _layernorm(
            x_ref[...], gw_ref[...], gb_ref[...], eps).astype(jnp.bfloat16)

    qkv = jnp.dot(ln_ref[...], w_ref[...],
                  preferred_element_type=jnp.float32) + b_ref[...]
    hd = q_ref.shape[-1]
    q_ref[...] = qkv[:, :hd].astype(jnp.bfloat16)          # scale already folded in
    k_ref[...] = qkv[:, hd:2 * hd].astype(jnp.bfloat16)
    v_ref[...] = qkv[:, 2 * hd:].astype(jnp.bfloat16)


def attn_kernel(x_ref, q_ref, k_ref, v_ref, ow_ref, ob_ref, out_ref, acc_ref,
                *, n_real):
    """One (q-tile, head) step: softmax attention for this head, then its slice
    of the out-projection accumulated into a (tq, D) f32 scratch; residual +
    bias added and written on the last head."""
    h = pl.program_id(2)

    @pl.when(h == 0)
    def _():
        acc_ref[...] = jnp.zeros_like(acc_ref)

    q = q_ref[...]                                          # (tq, hd) bf16
    k = k_ref[...]                                          # (Np, hd) bf16
    s = jax.lax.dot_general(q, k, (((1,), (1,)), ((), ())),
                            preferred_element_type=jnp.float32)   # (tq, Np)
    if n_real < k.shape[0]:                                 # mask padded key columns
        col = jax.lax.broadcasted_iota(jnp.int32, s.shape, 1)
        s = jnp.where(col < n_real, s, -1e30)
    s = s - jnp.max(s, axis=-1, keepdims=True)
    p = jnp.exp(s)
    inv = pl.reciprocal(jnp.sum(p, axis=-1, keepdims=True), approx=True)
    p = (p * inv).astype(jnp.bfloat16)
    o_h = jnp.dot(p, v_ref[...], preferred_element_type=jnp.float32)  # (tq, hd)
    acc_ref[...] += jnp.dot(o_h.astype(jnp.bfloat16), ow_ref[...],
                            preferred_element_type=jnp.float32)

    @pl.when(h == pl.num_programs(2) - 1)
    def _():
        out_ref[...] = x_ref[...] + acc_ref[...] + ob_ref[...]


def mlp_kernel(y_ref, gw_ref, gb_ref, f1w_ref, f1b_ref, f2w_ref, f2b_ref,
               out_ref, h_ref, acc_ref, *, eps):
    """LN2 (hoisted, computed once at ii==0 into a bf16 scratch) + fc1(chunk) +
    GELU + fc2(chunk) accumulated over I tiles; residual added on last tile."""
    ii = pl.program_id(2)

    @pl.when(ii == 0)
    def _():
        h_ref[...] = _layernorm(
            y_ref[...], gw_ref[...], gb_ref[...], eps).astype(jnp.bfloat16)
        acc_ref[...] = jnp.zeros_like(acc_ref)

    hc = jnp.dot(h_ref[...], f1w_ref[...],
                 preferred_element_type=jnp.float32) + f1b_ref[...]
    hc = _gelu_tanh(hc)
    acc_ref[...] += jnp.dot(hc.astype(jnp.bfloat16), f2w_ref[...],
                            preferred_element_type=jnp.float32)

    @pl.when(ii == pl.num_programs(2) - 1)
    def _():
        out_ref[...] = y_ref[...] + acc_ref[...] + f2b_ref[...]


# ----------------------------------------------------------------------------
# Wrappers (pallas_call plumbing)
# ----------------------------------------------------------------------------
def patch_embed(patches, w, b, pos, *, plan):
    """patches: (B, Np, K) bf16, w: (K, D) bf16, b: (1, D), pos: (Np, D)."""
    B, Np, K = patches.shape
    D = w.shape[1]
    tq = plan["tq"]
    return pl.pallas_call(
        patch_embed_kernel,
        out_shape=jax.ShapeDtypeStruct((B, Np, D), jnp.float32),
        grid=(B, Np // tq),
        in_specs=[
            pl.BlockSpec((None, tq, K), lambda bi, ni: (bi, ni, 0)),
            pl.BlockSpec((K, D), lambda bi, ni: (0, 0)),
            pl.BlockSpec((1, D), lambda bi, ni: (0, 0)),
            pl.BlockSpec((tq, D), lambda bi, ni: (ni, 0)),
        ],
        out_specs=pl.BlockSpec((None, tq, D), lambda bi, ni: (bi, ni, 0)),
        compiler_params=_cparams(("parallel", "parallel"), plan),
    )(patches, w, b, pos)


def ln_qkv(x, ln_w, ln_b, wqkv, bqkv, *, eps, plan):
    """x: (B, Np, D) f32 -> per-head q, k, v, each (B, H, Np, hd) bf16."""
    B, Np, D = x.shape
    H, _, hd3 = wqkv.shape
    hd = hd3 // 3
    tq = plan["tq"]
    kernel = functools.partial(ln_qkv_kernel, eps=eps)
    out_sd = jax.ShapeDtypeStruct((B, H, Np, hd), jnp.bfloat16)
    head_spec = pl.BlockSpec((None, None, tq, hd), lambda bi, ni, hi: (bi, hi, ni, 0))
    return pl.pallas_call(
        kernel,
        out_shape=(out_sd, out_sd, out_sd),
        grid=(B, Np // tq, H),
        in_specs=[
            pl.BlockSpec((None, tq, D), lambda bi, ni, hi: (bi, ni, 0)),
            pl.BlockSpec((1, D), lambda bi, ni, hi: (0, 0)),
            pl.BlockSpec((1, D), lambda bi, ni, hi: (0, 0)),
            pl.BlockSpec((None, D, hd3), lambda bi, ni, hi: (hi, 0, 0)),
            pl.BlockSpec((None, 1, hd3), lambda bi, ni, hi: (hi, 0, 0)),
        ],
        out_specs=(head_spec, head_spec, head_spec),
        scratch_shapes=[pltpu.VMEM((tq, D), jnp.bfloat16)],
        compiler_params=_cparams(("parallel", "parallel", "arbitrary"), plan),
    )(x, ln_w, ln_b, wqkv, bqkv)


def attn_block(x, q, k, v, ow, ob, *, plan):
    """Attention + out-proj + residual.  grid = (B, q_tiles, heads), heads are
    the (arbitrary) accumulation axis for the out-projection."""
    B, Np, D = x.shape
    H, _, hd = q.shape[0] and q.shape[1], q.shape[2], q.shape[3]
    H = q.shape[1]
    hd = q.shape[3]
    tq = plan["tq"]
    kernel = functools.partial(attn_kernel, n_real=plan["n_real"])
    return pl.pallas_call(
        kernel,
        out_shape=jax.ShapeDtypeStruct((B, Np, D), jnp.float32),
        grid=(B, Np // tq, H),
        in_specs=[
            pl.BlockSpec((None, tq, D), lambda bi, ni, hi: (bi, ni, 0)),          # x
            pl.BlockSpec((None, None, tq, hd), lambda bi, ni, hi: (bi, hi, ni, 0)),  # q
            pl.BlockSpec((None, None, Np, hd), lambda bi, ni, hi: (bi, hi, 0, 0)),   # k
            pl.BlockSpec((None, None, Np, hd), lambda bi, ni, hi: (bi, hi, 0, 0)),   # v
            pl.BlockSpec((None, hd, D), lambda bi, ni, hi: (hi, 0, 0)),           # ow (per head)
            pl.BlockSpec((1, D), lambda bi, ni, hi: (0, 0)),                      # ob
        ],
        out_specs=pl.BlockSpec((None, tq, D), lambda bi, ni, hi: (bi, ni, 0)),
        scratch_shapes=[pltpu.VMEM((tq, D), jnp.float32)],
        compiler_params=_cparams(("parallel", "parallel", "arbitrary"), plan),
    )(x, q, k, v, ow, ob)


def mlp_block(y, ln_w, ln_b, f1w, f1b, f2w, f2b, *, eps, plan):
    """LN2 + MLP + residual, tiled over token rows and the (padded) I dim."""
    B, Np, D = y.shape
    I_pad = f1w.shape[1]
    tn = plan["tn_mlp"]
    ti = plan["ti"]
    kernel = functools.partial(mlp_kernel, eps=eps)
    return pl.pallas_call(
        kernel,
        out_shape=jax.ShapeDtypeStruct((B, Np, D), jnp.float32),
        grid=(B, Np // tn, I_pad // ti),
        in_specs=[
            pl.BlockSpec((None, tn, D), lambda bi, ni, ii: (bi, ni, 0)),
            pl.BlockSpec((1, D), lambda bi, ni, ii: (0, 0)),
            pl.BlockSpec((1, D), lambda bi, ni, ii: (0, 0)),
            pl.BlockSpec((D, ti), lambda bi, ni, ii: (0, ii)),
            pl.BlockSpec((1, ti), lambda bi, ni, ii: (0, ii)),
            pl.BlockSpec((ti, D), lambda bi, ni, ii: (ii, 0)),
            pl.BlockSpec((1, D), lambda bi, ni, ii: (0, 0)),
        ],
        out_specs=pl.BlockSpec((None, tn, D), lambda bi, ni, ii: (bi, ni, 0)),
        scratch_shapes=[pltpu.VMEM((tn, D), jnp.bfloat16),   # hoisted LN(y)
                        pltpu.VMEM((tn, D), jnp.float32)],   # fc2 accumulator
        compiler_params=_cparams(("parallel", "parallel", "arbitrary"), plan),
    )(y, ln_w, ln_b, f1w, f1b, f2w, f2b)


def encoder_layer(x, lp, *, eps, plan):
    q, k, v = ln_qkv(x, lp["ln1w"], lp["ln1b"], lp["wqkv"], lp["bqkv"],
                     eps=eps, plan=plan)
    y = attn_block(x, q, k, v, lp["ow"], lp["ob"], plan=plan)
    return mlp_block(y, lp["ln2w"], lp["ln2b"], lp["f1w"], lp["f1b"],
                     lp["f2w"], lp["f2b"], eps=eps, plan=plan)


def extract_patches(images, patch_size):
    """NCHW -> (B, N, C*p*p), matching Conv2d(stride=kernel=p) unfold order."""
    B, C, H, W = images.shape
    p = patch_size
    Hp, Wp = H // p, W // p
    x = images.reshape(B, C, Hp, p, Wp, p)
    x = jnp.transpose(x, (0, 2, 4, 1, 3, 5))       # (B, Hp, Wp, C, p, p)
    return x.reshape(B, Hp * Wp, C * p * p)


# ----------------------------------------------------------------------------
# Host-side weight preparation (layout / padding / scale folding, done once)
# ----------------------------------------------------------------------------
def prepare_params(params, cfg, plan):
    D = cfg["hidden_size"]
    H = cfg["num_heads"]
    hd = D // H
    scale = hd ** -0.5
    I = cfg["intermediate_size"]
    n_real, n_pad, i_pad = plan["n_real"], plan["n_pad"], plan["i_pad"]

    pos = params["pos_emb"]
    if n_pad != n_real:
        pos = jnp.pad(pos, ((0, n_pad - n_real), (0, 0)))

    out = {"patch_w": params["patch_w"], "patch_b": params["patch_b"],
           "pos_emb": pos, "layers": []}
    # Last encoder layer is deleted in SigLipVisionModel.__init__.
    for lp in params["layers"][: cfg["num_hidden_layers"] - 1]:
        qkvw = lp["qkvw"].astype(jnp.float32)               # (D, 3D)
        qkvb = lp["qkvb"].astype(jnp.float32)               # (1, 3D)
        wq = qkvw[:, :D].reshape(D, H, hd) * scale          # scale folded into Q
        wk = qkvw[:, D:2 * D].reshape(D, H, hd)
        wv = qkvw[:, 2 * D:].reshape(D, H, hd)
        wqkv = jnp.transpose(jnp.concatenate([wq, wk, wv], axis=-1),
                             (1, 0, 2)).astype(jnp.bfloat16)          # (H, D, 3hd)
        bq = qkvb[0, :D].reshape(H, 1, hd) * scale
        bk = qkvb[0, D:2 * D].reshape(H, 1, hd)
        bv = qkvb[0, 2 * D:].reshape(H, 1, hd)
        bqkv = jnp.concatenate([bq, bk, bv], axis=-1)                  # (H, 1, 3hd)

        f1w, f1b, f2w = lp["f1w"], lp["f1b"], lp["f2w"]
        if i_pad != I:                                      # zero-pad MLP weights
            f1w = jnp.pad(f1w, ((0, 0), (0, i_pad - I)))
            f1b = jnp.pad(f1b, ((0, 0), (0, i_pad - I)))
            f2w = jnp.pad(f2w, ((0, i_pad - I), (0, 0)))

        out["layers"].append({
            "ln1w": lp["ln1w"], "ln1b": lp["ln1b"],
            "wqkv": wqkv, "bqkv": bqkv,
            "ow": lp["ow"].reshape(H, hd, D), "ob": lp["ob"],
            "ln2w": lp["ln2w"], "ln2b": lp["ln2b"],
            "f1w": f1w, "f1b": f1b, "f2w": f2w, "f2b": lp["f2b"],
        })
    return out


def siglip_vision_tower_forward(images, kparams, cfg, plan):
    """Full SigLipVisionTower.forward for a batched (B, C, H, W) input."""
    # TODO(synk): SigLipImageProcessor (PIL resize / rescale / normalize) is
    # host-side preprocessing with no Pallas equivalent.
    patches = extract_patches(images.astype(jnp.float32), cfg["patch_size"])
    B, n_real, K = patches.shape
    n_pad = plan["n_pad"]
    if n_pad != n_real:
        patches = jnp.pad(patches, ((0, 0), (0, n_pad - n_real), (0, 0)))
    x = patch_embed(patches.astype(jnp.bfloat16), kparams["patch_w"],
                    kparams["patch_b"], kparams["pos_emb"], plan=plan)
    # TODO(synk): cross-layer weight prefetch (stacked (L, ...) weights + layer
    # grid axis, or cross-call semaphore/VMEM futures) not implemented.
    for lp in kparams["layers"]:
        x = encoder_layer(x, lp, eps=cfg["eps"], plan=plan)
    # hidden_states[-1]: no post_layernorm, no head; drop padded rows.
    return x[:, :n_real, :].astype(images.dtype)


# ----------------------------------------------------------------------------
# Pure-JAX reference (f32 math with the same bf16-rounded weights)
# ----------------------------------------------------------------------------
def reference_forward(images, params, cfg):
    patches = extract_patches(images.astype(jnp.float32), cfg["patch_size"])
    x = patches @ params["patch_w"].astype(jnp.float32) \
        + params["patch_b"] + params["pos_emb"]
    D = cfg["hidden_size"]
    H = cfg["num_heads"]
    hd = D // H
    for lp in params["layers"][: cfg["num_hidden_layers"] - 1]:
        h = _layernorm(x, lp["ln1w"], lp["ln1b"], cfg["eps"])
        qkv = h @ lp["qkvw"].astype(jnp.float32) + lp["qkvb"]
        q, k, v = jnp.split(qkv, 3, axis=-1)
        B, N, _ = q.shape
        q = q.reshape(B, N, H, hd).transpose(0, 2, 1, 3) * (hd ** -0.5)
        k = k.reshape(B, N, H, hd).transpose(0, 2, 1, 3)
        v = v.reshape(B, N, H, hd).transpose(0, 2, 1, 3)
        s = jnp.einsum("bhqd,bhkd->bhqk", q, k)
        p = jax.nn.softmax(s, axis=-1)
        a = jnp.einsum("bhqk,bhkd->bhqd", p, v).transpose(0, 2, 1, 3)
        a = a.reshape(B, N, D)
        x = x + a @ lp["ow"].astype(jnp.float32) + lp["ob"]
        h = _layernorm(x, lp["ln2w"], lp["ln2b"], cfg["eps"])
        h = _gelu_tanh(h @ lp["f1w"].astype(jnp.float32) + lp["f1b"])
        x = x + h @ lp["f2w"].astype(jnp.float32) + lp["f2b"]
    return x.astype(images.dtype)


# ----------------------------------------------------------------------------
# Deterministic parameter construction (synthetic, not a checkpoint load)
# ----------------------------------------------------------------------------
def make_params(key, cfg):
    C = cfg["num_channels"]
    p = cfg["patch_size"]
    D = cfg["hidden_size"]
    I = cfg["intermediate_size"]
    N = (cfg["image_size"] // p) ** 2
    L = cfg["num_hidden_layers"]

    def nrm(k, shape, scale=0.02):
        return scale * jax.random.normal(k, shape, dtype=jnp.float32)

    keys = jax.random.split(key, 3 + 6 * L)
    params = {
        # conv weight (D, C, p, p) flattened to (C*p*p, D), stored in bf16
        "patch_w": nrm(keys[0], (C * p * p, D)).astype(jnp.bfloat16),
        "patch_b": nrm(keys[1], (1, D)),
        "pos_emb": nrm(keys[2], (N, D)),
        "layers": [],
    }
    for l in range(L):
        kk = keys[3 + 6 * l: 3 + 6 * (l + 1)]
        params["layers"].append({
            "ln1w": jnp.ones((1, D), jnp.float32),
            "ln1b": jnp.zeros((1, D), jnp.float32),
            # fused QKV weight/bias (q|k|v concatenated on the output dim)
            "qkvw": nrm(kk[0], (D, 3 * D)).astype(jnp.bfloat16),
            "qkvb": nrm(kk[1], (1, 3 * D)),
            "ow": nrm(kk[2], (D, D)).astype(jnp.bfloat16),
            "ob": nrm(kk[3], (1, D)),
            "ln2w": jnp.ones((1, D), jnp.float32),
            "ln2b": jnp.zeros((1, D), jnp.float32),
            "f1w": nrm(kk[4], (D, I)).astype(jnp.bfloat16),
            "f1b": jnp.zeros((1, I), jnp.float32),
            "f2w": nrm(kk[5], (I, D)).astype(jnp.bfloat16),
            "f2b": jnp.zeros((1, D), jnp.float32),
        })
    return params


if __name__ == "__main__":
    # Small, shape-consistent config (real SigLip: D=1152, I=4304, 27 layers,
    # 16 heads, 384x384 images, patch 14 -> N=729; padding/tiling logic above
    # is written for those dims, the test just uses a tiny instance).
    cfg = {
        "hidden_size": 32,
        "intermediate_size": 64,
        "num_hidden_layers": 3,     # model deletes the last one -> 2 layers run
        "num_heads": 4,
        "num_channels": 3,
        "image_size": 16,
        "patch_size": 4,
        "eps": 1e-6,
    }
    key = jax.random.PRNGKey(0)
    pkey, xkey = jax.random.split(key)
    params = make_params(pkey, cfg)

    plan = _plan(cfg)
    kparams = prepare_params(params, cfg, plan)

    B = 2
    images = jax.random.normal(
        xkey, (B, cfg["num_channels"], cfg["image_size"], cfg["image_size"]),
        dtype=jnp.float32,
    )

    out = siglip_vision_tower_forward(images, kparams, cfg, plan)
    jax.block_until_ready(out)

    expected_tokens = (cfg["image_size"] // cfg["patch_size"]) ** 2
    assert out.shape == (B, expected_tokens, cfg["hidden_size"]), out.shape

    # sanity check vs. plain-JAX reference (bf16 weights, f32 math); the kernel
    # additionally rounds MXU inputs / intermediates to bf16 and uses an
    # approximate softmax reciprocal, hence the lenient tolerance.
    ref = reference_forward(images, params, cfg)
    assert jnp.allclose(out, ref, atol=2e-2, rtol=2e-2)

    print("KERNEL_OK")
</pallas_src>

<mosaic_0001>
module attributes {stable_mosaic.version = 11 : i64} {
  func.func @patch_embed_kernel(%arg0: i32, %arg1: i32, %arg2: memref<1x16x48xbf16, #tpu.memory_space<vmem>>, %arg3: memref<48x32xbf16, #tpu.memory_space<vmem>>, %arg4: memref<1x32xf32, #tpu.memory_space<vmem>>, %arg5: memref<16x32xf32, #tpu.memory_space<vmem>>, %arg6: memref<1x16x32xf32, #tpu.memory_space<vmem>>) attributes {dimension_semantics = [#tpu.dimension_semantics<parallel>, #tpu.dimension_semantics<parallel>], iteration_bounds = array<i64: 2, 1>, scalar_prefetch = 0 : i64, scratch_operands = 0 : i64, tpu.core_type = #tpu.core_type<tc>, window_params = [{transform_indices = @transform_0, window_bounds = array<i64: 1, 16, 48>}, {pipeline_mode = #tpu.pipeline_mode<synchronous>, transform_indices = @transform_1, window_bounds = array<i64: 48, 32>}, {pipeline_mode = #tpu.pipeline_mode<synchronous>, transform_indices = @transform_2, window_bounds = array<i64: 1, 32>}, {transform_indices = @transform_3, window_bounds = array<i64: 16, 32>}, {transform_indices = @transform_4, window_bounds = array<i64: 1, 16, 32>}]} {
    %c0 = arith.constant 0 : index
    %c0_0 = arith.constant 0 : index
    %c0_1 = arith.constant 0 : index
    %0 = vector.load %arg2[%c0, %c0_0, %c0_1] : memref<1x16x48xbf16, #tpu.memory_space<vmem>>, vector<1x16x48xbf16>
    %1 = vector.shape_cast %0 : vector<1x16x48xbf16> to vector<16x48xbf16>
    %c0_2 = arith.constant 0 : index
    %c0_3 = arith.constant 0 : index
    %2 = vector.load %arg3[%c0_2, %c0_3] : memref<48x32xbf16, #tpu.memory_space<vmem>>, vector<48x32xbf16>
    %cst = arith.constant dense<0.000000e+00> : vector<16x32xf32>
    %3 = tpu.matmul %1, %2, %cst {dimension_numbers = #tpu.dot_dimension_numbers<[1], [0], [0], [1], [0, 0, 1, 1], [], []>} : vector<16x48xbf16>, vector<48x32xbf16>, vector<16x32xf32> -> vector<16x32xf32>
    %c0_4 = arith.constant 0 : index
    %c0_5 = arith.constant 0 : index
    %4 = vector.load %arg4[%c0_4, %c0_5] : memref<1x32xf32, #tpu.memory_space<vmem>>, vector<1x32xf32>
    %5 = vector.broadcast %4 : vector<1x32xf32> to vector<16x32xf32>
    %6 = arith.addf %3, %5 : vector<16x32xf32>
    %c0_6 = arith.constant 0 : index
    %c0_7 = arith.constant 0 : index
    %7 = vector.load %arg5[%c0_6, %c0_7] : memref<16x32xf32, #tpu.memory_space<vmem>>, vector<16x32xf32>
    %8 = arith.addf %6, %7 : vector<16x32xf32>
    %c0_8 = arith.constant 0 : index
    %c0_9 = arith.constant 0 : index
    %c0_10 = arith.constant 0 : index
    %9 = vector.load %arg6[%c0_8, %c0_9, %c0_10] : memref<1x16x32xf32, #tpu.memory_space<vmem>>, vector<1x16x32xf32>
    %10 = vector.shape_cast %9 : vector<1x16x32xf32> to vector<16x32xf32>
    %11 = vector.shape_cast %8 : vector<16x32xf32> to vector<1x16x32xf32>
    tpu.vector_store %arg6[%c0_8, %c0_9, %c0_10], %11 {strides = array<i32>} : memref<1x16x32xf32, #tpu.memory_space<vmem>>, vector<1x16x32xf32>,
    return
  }
  func.func @transform_0(%arg0: i32, %arg1: i32) -> (i32, i32, i32) {
    %c0_i32 = arith.constant 0 : i32
    %c0_i32_0 = arith.constant 0 : i32
    return %arg0, %arg1, %c0_i32 : i32, i32, i32
  }
  func.func @transform_1(%arg0: i32, %arg1: i32) -> (i32, i32) {
    %c0_i32 = arith.constant 0 : i32
    %c0_i32_0 = arith.constant 0 : i32
    %c0_i32_1 = arith.constant 0 : i32
    return %c0_i32, %c0_i32_0 : i32, i32
  }
  func.func @transform_2(%arg0: i32, %arg1: i32) -> (i32, i32) {
    %c0_i32 = arith.constant 0 : i32
    %c0_i32_0 = arith.constant 0 : i32
    %c0_i32_1 = arith.constant 0 : i32
    return %c0_i32, %c0_i32_0 : i32, i32
  }
  func.func @transform_3(%arg0: i32, %arg1: i32) -> (i32, i32) {
    %c0_i32 = arith.constant 0 : i32
    %c0_i32_0 = arith.constant 0 : i32
    return %arg1, %c0_i32 : i32, i32
  }
  func.func @transform_4(%arg0: i32, %arg1: i32) -> (i32, i32, i32) {
    %c0_i32 = arith.constant 0 : i32
    %c0_i32_0 = arith.constant 0 : i32
    return %arg0, %arg1, %c0_i32 : i32, i32, i32
  }
}

</mosaic_0001>

<bundles_post_ra>
// kernel: tpu_custom_call.1
= control target key start
LH: loop header
LB: loop body
LE: loop exit
PB: predicated region body
PF: predicated region fallthrough
CT: control target
= control target key end

     0   :  { %9 = vsyncpa [#allocation3], 0  ;;  %s789_s0 = inlined_call_operand.vmem [shape: bf16[2,16,48], index: 0, kind: input, shape index: {}]   ;;  %s790_s1 = inlined_call_operand.vmem [shape: bf16[48,32], index: 1, kind: input, shape index: {}]   ;;  %s791_s2 = inlined_call_operand.vmem [shape: f32[1,32], index: 2, kind: input, shape index: {}]   ;;  %s792_s3 = inlined_call_operand.vmem [shape: f32[16,32], index: 3, kind: input, shape index: {}]   ;;  %s793_s4 = inlined_call_operand.hbm [shape: f32[2,16,32], index: 4, kind: output, shape index: {}]  }
   0x1   :  { %11 = vsyncpa [#allocation3 + $0x1], 0  ;;  %s657_s15 = smov 0   ;;  %s659_s16 = smov 0  }
   0x2   :  { %s661_s17 = smov 0   ;;  %s663_s18 = smov 0  }
   0x3   :  { %s665_s19 = smov 0   ;;  %s667_s20 = smov 0  }
   0x4 LB: > { %s450_s21 = sadd.s32 4294967295, %s625_s20   ;;  %s451_s22 = sadd.s32 4294967294, %s625_s20   ;;  %s625_s20 = sphi %s667_s20, %s17_s20   ;;  %s621_s19 = sphi %s665_s19, %s800_s19   ;;  %s617_s18 = sphi %s663_s18, %s799_s18   ;;  %s613_s17 = sphi %s661_s17, %s798_s17   ;;  %s609_s16 = sphi %s659_s16, %s797_s16   ;;  %s605_s15 = sphi %s657_s15, %s796_s15  }
   0x5   : > { %s29_s23 = sadd.s32 1, %s621_s19  ;;  %s134_s24 = sadd.s32 1, %s613_s17 }
   0x6   : > { %p31_p0 = scmp.ge.s32.totalorder %s29_s23, 2  ;;  %p144_p1 = scmp.ne.s32.totalorder %s613_s17, %s609_s16 }
   0x7   : > { %p145_p2 = scmp.eq.s32.totalorder %s450_s21, 1  ;;  %p150_p3 = scmp.ne.s32.totalorder %s609_s16, %s605_s15 }
   0x8   : > { %s802_s23 = smov (%p31_p0, %s29_s23), 0  ;;  %p151_p5 = scmp.eq.s32.totalorder %s451_s22, 1 }
   0x9   : > { %p697_p4 = por %p145_p2, %p144_p1  ;;  %s129_s26 = ssub.s32 %s621_s19, %s802_s23 }
   0xa   : > { %p455_p6 = scmp.ge.s32.totalorder %s625_s20, 1  ;;  %p132_p7 = scmp.eq.s32.totalorder %s129_s26, 0 }
   0xb   : > { %p704_p8 = por %p151_p5, %p150_p3  ;;  %p197_p9 = scmp.lt.s32.totalorder %s625_s20, 3 }
   0xc   : > { %s710_s28 = scalar_select %p132_p7, %s613_s17, %s134_s24  }
   0xd   : > { %p198_p10 = pnand %p455_p6, %p197_p9 }
   0xe   : > { %p233_p11 = scmp.lt.s32.totalorder (!%p198_p10), %s617_s18, 1  ;;  %s229_s14 = sand.u32 (!%p198_p10), 1, %s609_s16  }
   0xf   : > { %201 = sbr.rel (%p198_p10) target bundleno = 248 (0xf8), region = 36  ;;  %s456_s24 = sshll.u32 (!%p198_p10), %s229_s14, 4 }
  0x10   : > { %s231_s30 = scalar_lea.vmem (!%p198_p10), [#allocation2], %s456_s24  ;;  %s471_s6 = sshll.u32 (!%p198_p10), %s617_s18, 8 }
  0x11   : > { %s356_s5 = sshll.u32 (!%p198_p10), %s231_s30, 4  ;;  %s740_s11 = scalar_lea.hbm (!%p198_p10), %s793_s4, %s471_s6  ;;  %s742_s5 = int_to_ptr.vmem [resolvable:$true] %s356_s5 }
  0x12   : > { %s549_s12 = scalar_lea.vmem (!%p198_p10), %s742_s5, 256 }
  0x13   : > { %p550_p12 = scmp.ne.s32.totalorder (!%p198_p10), %s742_s5, %s549_s12 }
  0x14   : > { %v545_v0 = vld [vmem:[%s790_s1 + $0x10] sm:$0xff]   ;;  %v627_v1 = vmov 0.0   ;;  %v546_v2 = vld [vmem:[%s790_s1 + $0x8] sm:$0xff]   ;;  %vm628_vm0 = vmmov 0   ;;  %s234_s7 = scalar_select %p233_p11, %s617_s18, 1  ;;  %v547_v3 = vld [vmem:[%s790_s1] sm:$0xff]  }
  0x15   : > { %476 = vmatprep.subr.bf16.mxu0 %v627_v1  ;;  %482 = vmatprep.mubr.msk.bf16.mxu0 %vm628_vm0, %v627_v1  ;;  %vm288_vm1 = vcmask 392192   ;;  %v459_v5 = vld [vmem:[%s791_s2] ss:$0 sm:$0xff]  ;;  %vm337_vm2 = vcmask 261120   ;;  %v334_v12 = vld [vmem:[%s792_s3 + $0x8] sm:$0xff]  ;;  %s744_s18 = scalar_lea.sflag [#allocation3], %s229_s14  ;;  %p551_p13 = pnand %p550_p12, %p697_p4 }
  0x16   : > { %477 = vmatpush3.bf16.msra.mxu0 %v545_v0  ;;  %s470_s10 = sshll.u32 %s234_s7, 3  ;;  %v333_v7 = vld [vmem:[%s792_s3] sm:$0xff] }
  0x17   : > { %478 = vmatprep.subr.bf16.mxu0 %v627_v1  ;;  %s240_s13 = scalar_lea.vmem %s789_s0, %s470_s10  ;;  %p552_p0 = pneg %p551_p13 }
  0x18   : > { %v548_v4 = vld [vmem:[%s240_s13] sm:$0xff]   ;;  %s629_s13 = smov [#allocation2]  }
  0x19   : > { %s553_s21 = sshll.u32 %s629_s13, 4  ;;  %s554_s21 = int_to_ptr.vmem [resolvable:$false] %s553_s21 }
  0x1a   : > { %479 = vmatpush3.bf16.msra.mxu0 %v546_v2  ;;  %s555_s22 = scalar_lea.vmem %s554_s21, 512  ;;  %p556_p1 = scmp.lt.s32.totalorder %s742_s5, %s554_s21 }
  0x1b   : > { %480 = vmatprep.subr.bf16.mxu0 %v627_v1  ;;  %p557_p2 = scmp.lt.s32.totalorder %s555_s22, %s549_s12 }
  0x1d   : > { %p558_p3 = por %p557_p2, %p556_p1 }
  0x1e   : > { %481 = vmatpush3.bf16.msra.mxu0 %v547_v3 }
  0x1f   : > { %p559_p5 = pnand %p558_p3, %p552_p0 }
  0x21   : > { %483 = vmatmul.mubr.msk.bf16.vlgmr.msra.gmra.mxu0 %vm288_vm1, %v548_v4 }
  0xe1   : > { %v326_v6 = vpop.f32.mrf.mxu0 }
  0xe2   : > { %v327_v8 = vadd.f32 %v459_v5, %v326_v6 }
  0xe3   : > { %v484_v9 = vpop.f32.mrf.mxu0 }
  0xe4   : > { %v335_v10 = vadd.f32 %v333_v7, %v327_v8 }
  0xe5   : > { %v329_v11 = vpop.f32.mrf.mxu0 }
  0xe6   : > { %338 = vst.msk [vmem:[%s231_s30] sm:$0xff] %vm337_vm2, %v335_v10  ;;  %v330_v13 = vadd.f32 %v459_v5, %v329_v11 }
  0xe7   : > { %v485_v14 = vpop.f32.mrf.mxu0 }
  0xe8   : > { %v336_v15 = vadd.f32 %v334_v12, %v330_v13 }
  0xea   : > { %339 = vst.msk [vmem:[%s231_s30 + $0x8] sm:$0xff] %vm337_vm2, %v336_v15 }
  0xeb   : > { %562 = shalt.err (!%p559_p5)
}
  0xec   : > { %s563_s14 = scalar_lea.hbm %s740_s11, 256  ;;  %s567_s29 = scalar_lea.hbm %s793_s4, 512 }
  0xed   : > { %p564_p6 = scmp.ne.s32.totalorder %s740_s11, %s563_s14  ;;  %p568_p10 = scmp.lt.s32.totalorder %s740_s11, %s793_s4 }
  0xee   : > { %p569_p11 = scmp.lt.s32.totalorder %s567_s29, %s563_s14 }
  0xef   : > { %p565_p7 = pnand %p564_p6, %p697_p4 }
  0xf0   : > { %p570_p12 = por %p569_p11, %p568_p10 }
  0xf1   : > { %p566_p9 = pneg %p565_p7 }
  0xf3   : > { %p571_p13 = pnand %p570_p12, %p566_p9 }
  0xf5   : > { %574 = shalt.err (!%p571_p13)
}
  0xf6   : > { %s630_s7 = smov 128   ;;  %s631_s8 = smov 8  }
  0xf7   : > { %486 = dma.vmem_to_hbm [thread:$0]  (%p697_p4), %s742_s5, 256, %s740_s11, %s744_s18, %s630_s7, %s630_s7, %s631_s8  }
  0xf8 PF: > { %p492_p0 = scmp.ge.s32.totalorder %s625_s20, 2  ;;  %s371_s9 = sand.u32 1, %s605_s15  }
  0xf9   : > { %s372_s10 = scalar_lea.sflag [#allocation3], %s371_s9 }
  0xfa   : > { %p489_p1 = pnand %p492_p0, %p704_p8 }
  0xfc   : > { %p490_p2 = pneg %p489_p1 }
  0xfe   : > { %600 = dma.done.wait (%p490_p2), %s372_s10, 256  }
  0xff   : > { %602 = vsyncadd (%p490_p2), %s372_s10, 4294967040  ;;  %s17_s20 = sadd.s32 1, %s625_s20   ;;  %s796_s15 = smov %s609_s16 }
 0x100   : > { %p14_p3 = scmp.ge.s32.totalorder %s17_s20, 4   ;;  %s797_s16 = smov %s613_s17 }
 0x101   : > { %s798_s17 = smov %s710_s28  ;;  %s799_s18 = smov %s621_s19 }
 0x102   : > { %s800_s19 = smov %s802_s23  ;;  %16 = sbr.rel (!%p14_p3) target bundleno = 4 (0x4), region = 74 }
 0x107   :  { %377 = vsyncpa [#allocation3], 1 }
 0x108   :  { %379 = vsyncpa [#allocation3 + $0x1], 1 }

</bundles_post_ra>
